<compile_context>
chip_gen: v5e
topology: v5e:2x2
jax: 0.10.0
libtpu: 0.0.40
codegen_flags: <defaults>
</compile_context>

<pallas_src>
import numpy as np
import jax
import jax.numpy as jnp
from jax.experimental import pallas as pl
from jax.experimental.pallas import tpu as pltpu

BN_EPS = 1e-5
LANE = 128
SUBLANE = 8


def _round_up(x, m):
    return ((x + m - 1) // m) * m


def _divisor_tile(n_pad, cap):
    """Largest multiple of 128 <= cap that divides n_pad (n_pad is a mult of 128)."""
    t = max(LANE, min(cap, n_pad))
    t -= t % LANE
    while n_pad % t:
        t -= LANE
    return t


def _choose_gin_tiles(n_pad, tm_cap=512, tk_cap=512):
    tk = _divisor_tile(n_pad, tk_cap)
    tm = _divisor_tile(n_pad, tm_cap)
    # Keep >= 2 row tiles so the "parallel" grid axis can shard across the two
    # TensorCores of a v7x chip (single-TC v5e/v6e are unaffected).
    if tm == n_pad and n_pad >= 256:
        tm = n_pad // 2
    return tm, tk


def _vmem_limit(footprint_bytes):
    # Leave the default scoped-VMEM window for small problems; only raise it
    # (capped well under v7x's 64 MiB physical VMEM) when larger tiles need it.
    if footprint_bytes <= 12 * 1024 * 1024:
        return None
    return int(min(footprint_bytes + (8 << 20), 48 << 20))


# ---------------------------------------------------------------------------
# Kernel 1: transform matmul pass
#   h = x @ W + b   (rows >= n_valid masked to 0 so BN stats stay correct)
#   emits per-row-tile partial sum / sum-of-squares for BatchNorm.
#   Output h is bf16 (consumed by the bf16 aggregation matmul of layer 0).
# ---------------------------------------------------------------------------
def _make_transform_kernel(n_valid):
    def kernel(x_ref, w_ref, b_ref, h_ref, s_ref, ss_ref):
        h = jnp.dot(x_ref[...], w_ref[...],
                    preferred_element_type=jnp.float32) + b_ref[...]
        tm = h.shape[0]
        row = (pl.program_id(0) * tm
               + jax.lax.broadcasted_iota(jnp.int32, h.shape, 0))
        h = jnp.where(row < n_valid, h, 0.0)      # padded rows stay exactly 0
        h_ref[...] = h.astype(h_ref.dtype)
        s_ref[...] = jnp.sum(h, axis=0, keepdims=True)[None]
        ss_ref[...] = jnp.sum(h * h, axis=0, keepdims=True)[None]
    return kernel


def transform_matmul(x_pad, w_pad, b_pad, n_valid, tm):
    n_pad, f_pad = x_pad.shape
    h_pad = w_pad.shape[1]
    t = n_pad // tm
    return pl.pallas_call(
        _make_transform_kernel(n_valid),
        grid=(t,),
        in_specs=[
            pl.BlockSpec((tm, f_pad), lambda i: (i, 0)),
            pl.BlockSpec((f_pad, h_pad), lambda i: (0, 0)),   # resident
            pl.BlockSpec((1, h_pad), lambda i: (0, 0)),       # resident
        ],
        out_specs=[
            pl.BlockSpec((tm, h_pad), lambda i: (i, 0)),
            pl.BlockSpec((1, 1, h_pad), lambda i: (i, 0, 0)),
            pl.BlockSpec((1, 1, h_pad), lambda i: (i, 0, 0)),
        ],
        out_shape=(
            jax.ShapeDtypeStruct((n_pad, h_pad), jnp.bfloat16),
            jax.ShapeDtypeStruct((t, 1, h_pad), jnp.float32),
            jax.ShapeDtypeStruct((t, 1, h_pad), jnp.float32),
        ),
        compiler_params=pltpu.CompilerParams(
            dimension_semantics=("parallel",)),
    )(x_pad, w_pad, b_pad)


# ---------------------------------------------------------------------------
# Kernel 2: one GIN layer (fused previous-BN + aggregation + MLP + ReLU):
#   hn  = h * scale + shift         (previous stage's BatchNorm, fused)
#   agg = (A + I) @ hn              (bf16 x bf16, f32 VMEM accumulator)
#   z   = ReLU(ReLU(agg @ W1) @ W2) (bf16 operands, f32 accumulation)
#   per-row-tile partial BN statistics of z emitted on the last K step.
# Padded rows/cols of A+I are zero and the MLP has no bias, so padded rows of
# z are exactly zero and never pollute the statistics.
# ---------------------------------------------------------------------------
def _gin_layer_kernel(a_ref, h_ref, scale_ref, shift_ref, w1_ref, w2_ref,
                      out_ref, s_ref, ss_ref, acc_ref):
    k = pl.program_id(1)
    tk = a_ref.shape[1]

    @pl.when(k == 0)
    def _():
        acc_ref[...] = jnp.zeros_like(acc_ref)

    # h arrives pre-BatchNorm (bf16); apply the previous stage's BN affine
    # inline (no standalone BN pass over HBM for intermediate layers).
    if h_ref.shape[0] == tk:                       # streamed (tk, h_pad) block
        h_blk = h_ref[...]
    else:                                          # VMEM-resident full h
        start = pl.multiple_of(k * tk, tk)
        h_blk = h_ref[pl.ds(start, tk), :]
    hn = (h_blk.astype(jnp.float32) * scale_ref[...]
          + shift_ref[...]).astype(jnp.bfloat16)

    # bf16 x bf16 aggregation matmul, f32 accumulation (full MXU rate).
    acc_ref[...] += jnp.dot(a_ref[...], hn, preferred_element_type=jnp.float32)

    @pl.when(k == pl.num_programs(1) - 1)
    def _():
        agg = acc_ref[...].astype(jnp.bfloat16)
        z = jnp.dot(agg, w1_ref[...], preferred_element_type=jnp.float32)
        z = jnp.maximum(z, 0.0).astype(jnp.bfloat16)
        z = jnp.dot(z, w2_ref[...], preferred_element_type=jnp.float32)
        z = jnp.maximum(z, 0.0)                    # module-level act(x)
        out_ref[...] = z.astype(out_ref.dtype)
        s_ref[...] = jnp.sum(z, axis=0, keepdims=True)[None]
        ss_ref[...] = jnp.sum(z * z, axis=0, keepdims=True)[None]


def gin_layer_matmul(a_hat, h, scale, shift, w1, w2, tm, tk, *, h_resident):
    n_pad, h_pad = h.shape
    t, kk = n_pad // tm, n_pad // tk

    if h_resident:
        # h DMA'd once per layer instead of once per row tile.
        h_spec = pl.BlockSpec((n_pad, h_pad), lambda i, j: (0, 0))
        h_bytes = h.size * 2
    else:
        h_spec = pl.BlockSpec((tk, h_pad), lambda i, j: (j, 0))
        h_bytes = h.size * 2 * t                   # re-read per row tile

    flops = (2 * n_pad * n_pad * h_pad             # aggregation
             + 4 * n_pad * h_pad * h_pad           # 2-layer MLP
             + 2 * n_pad * h_pad)                  # fused BN affine
    bytes_accessed = (a_hat.size * 2 + h_bytes + n_pad * h_pad * 2
                      + (w1.size + w2.size) * 2
                      + 2 * t * h_pad * 4 + 2 * h_pad * 4)

    footprint = (2 * tm * tk * 2                                     # A (dbuf)
                 + (2 * n_pad * h_pad * 2 if h_resident
                    else 2 * tk * h_pad * 2)                         # h
                 + 2 * tm * h_pad * 2                                # out (dbuf)
                 + tm * h_pad * 4                                    # acc scratch
                 + 2 * 2 * h_pad * h_pad * 2                         # W1, W2
                 + 8 * h_pad * 4)                                    # scale/shift/stats

    return pl.pallas_call(
        _gin_layer_kernel,
        grid=(t, kk),
        in_specs=[
            pl.BlockSpec((tm, tk), lambda i, j: (i, j)),             # A+I tile (bf16)
            h_spec,                                                  # h (bf16)
            pl.BlockSpec((1, h_pad), lambda i, j: (0, 0)),           # BN scale
            pl.BlockSpec((1, h_pad), lambda i, j: (0, 0)),           # BN shift
            pl.BlockSpec((h_pad, h_pad), lambda i, j: (0, 0)),       # W1 (bf16)
            pl.BlockSpec((h_pad, h_pad), lambda i, j: (0, 0)),       # W2 (bf16)
        ],
        out_specs=[
            pl.BlockSpec((tm, h_pad), lambda i, j: (i, 0)),
            pl.BlockSpec((1, 1, h_pad), lambda i, j: (i, 0, 0)),
            pl.BlockSpec((1, 1, h_pad), lambda i, j: (i, 0, 0)),
        ],
        out_shape=(
            jax.ShapeDtypeStruct((n_pad, h_pad), jnp.bfloat16),
            jax.ShapeDtypeStruct((t, 1, h_pad), jnp.float32),
            jax.ShapeDtypeStruct((t, 1, h_pad), jnp.float32),
        ),
        scratch_shapes=[pltpu.VMEM((tm, h_pad), jnp.float32)],
        compiler_params=pltpu.CompilerParams(
            dimension_semantics=("parallel", "arbitrary"),
            vmem_limit_bytes=_vmem_limit(footprint)),
        cost_estimate=pl.CostEstimate(
            flops=int(flops), transcendentals=0,
            bytes_accessed=int(bytes_accessed)),
    )(a_hat, h, scale, shift, w1, w2)


# ---------------------------------------------------------------------------
# Kernel 3: standalone BatchNorm apply (only for the final layer), large row
# tiles since this pass is purely memory-bound.
# ---------------------------------------------------------------------------
def _affine_kernel(h_ref, scale_ref, shift_ref, o_ref):
    o_ref[...] = (h_ref[...].astype(jnp.float32) * scale_ref[...]
                  + shift_ref[...])


def bn_apply(h, scale, shift, tm):
    n_pad, h_pad = h.shape
    t = n_pad // tm
    return pl.pallas_call(
        _affine_kernel,
        grid=(t,),
        in_specs=[
            pl.BlockSpec((tm, h_pad), lambda i: (i, 0)),
            pl.BlockSpec((1, h_pad), lambda i: (0, 0)),
            pl.BlockSpec((1, h_pad), lambda i: (0, 0)),
        ],
        out_specs=pl.BlockSpec((tm, h_pad), lambda i: (i, 0)),
        out_shape=jax.ShapeDtypeStruct((n_pad, h_pad), jnp.float32),
        compiler_params=pltpu.CompilerParams(
            dimension_semantics=("parallel",)),
    )(h, scale, shift)


def _bn_scale_shift(s, ss, n_valid, gamma, beta):
    """Combine per-tile partial sums into per-feature scale/shift (tiny)."""
    total = jnp.sum(s, axis=0)          # [1, H_pad]
    total_sq = jnp.sum(ss, axis=0)      # [1, H_pad]
    mean = total / n_valid
    var = jnp.maximum(total_sq / n_valid - mean * mean, 0.0)  # biased variance
    inv_std = jax.lax.rsqrt(var + BN_EPS)
    scale = gamma * inv_std
    shift = beta - mean * scale
    return scale, shift


# ---------------------------------------------------------------------------
# GIN2 forward (glue / padding in plain JAX)
# ---------------------------------------------------------------------------
def gin2_forward(x, edge_index, batch, num_graphs, params,
                 *, row_tile=512, k_tile=512):
    N, F = x.shape
    H = params["w_t"].shape[1]

    n_pad = _round_up(max(N, SUBLANE), LANE)
    f_pad = _round_up(F, SUBLANE)          # do NOT pad tiny feature dim to 128
    h_pad = _round_up(H, LANE)
    tm, tk = _choose_gin_tiles(n_pad, row_tile, k_tile)
    ew_tile = _divisor_tile(n_pad, 2048)   # big tile for the mem-bound passes

    x_pad = jnp.zeros((n_pad, f_pad), jnp.float32).at[:N, :F].set(x)

    # Dense A + I (GINConv with eps=0: x_i + sum_{j in N(i)} x_j), bf16.
    # A[dst, src] = #edges(src -> dst); entries are small integer counts, so
    # bf16 is exact.  Padded rows/cols are zero.
    # TODO(synk): for genuinely sparse / very large graphs, replace the dense
    # (A+I)@h with a CSR scalar-prefetch gather (PrefetchScalarGridSpec driving
    # per-row DMAs) instead of materializing an N^2 matrix.
    src, dst = edge_index[0], edge_index[1]
    a = jnp.zeros((n_pad, n_pad), jnp.float32).at[dst, src].add(1.0)
    diag = jnp.arange(N)
    a = a.at[diag, diag].add(1.0)
    a_hat = a.astype(jnp.bfloat16)

    # Keep h VMEM-resident inside the GIN layer when the whole bf16 matrix
    # comfortably fits; otherwise stream it per K tile.
    h_resident = (n_pad * h_pad * 2) <= (6 << 20)

    # --- transform: Linear(nfeat, nhid, bias=True) -> BatchNorm1d -------------
    w_t = jnp.zeros((f_pad, h_pad), jnp.float32).at[:F, :H].set(params["w_t"])
    b_t = jnp.zeros((1, h_pad), jnp.float32).at[:, :H].set(params["b_t"])
    gamma = jnp.ones((1, h_pad), jnp.float32).at[:, :H].set(params["gamma_t"])
    beta = jnp.zeros((1, h_pad), jnp.float32).at[:, :H].set(params["beta_t"])

    h, s, ss = transform_matmul(x_pad, w_t, b_t, N, ew_tile)
    scale, shift = _bn_scale_shift(s, ss, float(N), gamma, beta)

    # --- GIN layers (previous BN fused into the consuming layer) --------------
    for layer in params["layers"]:
        w1 = jnp.zeros((h_pad, h_pad), jnp.float32).at[:H, :H] \
                .set(layer["w1"]).astype(jnp.bfloat16)
        w2 = jnp.zeros((h_pad, h_pad), jnp.float32).at[:H, :H] \
                .set(layer["w2"]).astype(jnp.bfloat16)
        gamma = jnp.ones((1, h_pad), jnp.float32).at[:, :H].set(layer["gamma"])
        beta = jnp.zeros((1, h_pad), jnp.float32).at[:, :H].set(layer["beta"])
        # Dropout(p=0) == identity
        h, s, ss = gin_layer_matmul(a_hat, h, scale, shift, w1, w2, tm, tk,
                                    h_resident=h_resident)
        scale, shift = _bn_scale_shift(s, ss, float(N), gamma, beta)

    # Final BatchNorm has no consuming GIN layer -> standalone apply (f32 out).
    h = bn_apply(h, scale, shift, ew_tile)
    h_valid = h[:N, :H]

    # Per-graph ragged split done on host (forces a device->host sync; keep it
    # off the critical path if the embeddings are consumed on device).
    h_np = np.asarray(jax.block_until_ready(h_valid))
    batch_np = np.asarray(batch)
    emb_list = [h_np[batch_np == g] for g in range(num_graphs)]
    return h_valid, emb_list


# ---------------------------------------------------------------------------
# Pure-JAX f32 reference (for correctness check)
# ---------------------------------------------------------------------------
def gin2_forward_reference(x, edge_index, params):
    N = x.shape[0]
    src, dst = edge_index[0], edge_index[1]
    a = jnp.zeros((N, N), jnp.float32).at[dst, src].add(1.0) + jnp.eye(N)

    def bn(h, gamma, beta):
        mean = jnp.mean(h, axis=0, keepdims=True)
        var = jnp.mean((h - mean) ** 2, axis=0, keepdims=True)
        return (h - mean) * jax.lax.rsqrt(var + BN_EPS) * gamma + beta

    h = bn(x @ params["w_t"] + params["b_t"],
           params["gamma_t"], params["beta_t"])
    for layer in params["layers"]:
        agg = a @ h
        z = jnp.maximum(agg @ layer["w1"], 0.0)
        z = jnp.maximum(z @ layer["w2"], 0.0)
        h = bn(z, layer["gamma"], layer["beta"])
    return h


def init_params(key, nfeat, nhid, nlayer):
    keys = jax.random.split(key, 2 * nlayer + 2)
    params = {
        # Linear(nfeat, nhid) stored as [in, out] (i.e. W^T)
        "w_t": jax.random.normal(keys[0], (nfeat, nhid), jnp.float32)
               * (1.0 / np.sqrt(nfeat)),
        "b_t": jax.random.normal(keys[1], (1, nhid), jnp.float32) * 0.1,
        "gamma_t": jnp.ones((1, nhid), jnp.float32),
        "beta_t": jnp.zeros((1, nhid), jnp.float32),
        "layers": [],
    }
    for i in range(nlayer):
        w1 = jax.random.normal(keys[2 + 2 * i], (nhid, nhid), jnp.float32) \
             * (1.0 / np.sqrt(nhid))
        w2 = jax.random.normal(keys[3 + 2 * i], (nhid, nhid), jnp.float32) \
             * (1.0 / np.sqrt(nhid))
        params["layers"].append({
            "w1": w1, "w2": w2,
            "gamma": jnp.ones((1, nhid), jnp.float32),
            "beta": jnp.zeros((1, nhid), jnp.float32),
        })
    return params


if __name__ == "__main__":
    # 2 graphs x 100 nodes -> N=200, padded to 256: 2 row tiles x 1 K tile,
    # exercising the accumulator init/finalize, resident-h path and masking.
    nfeat, nhid, nlayer = 16, 64, 2
    num_graphs = 2
    nodes_per_graph = 100
    N = num_graphs * nodes_per_graph

    key = jax.random.PRNGKey(0)
    kx, kp = jax.random.split(key)
    x = jax.random.normal(kx, (N, nfeat), jnp.float32)

    # Deterministic edges: undirected ring within each graph.
    src_list, dst_list = [], []
    for g in range(num_graphs):
        off = g * nodes_per_graph
        for i in range(nodes_per_graph):
            a_node = off + i
            b_node = off + (i + 1) % nodes_per_graph
            src_list += [a_node, b_node]
            dst_list += [b_node, a_node]
    edge_index = jnp.asarray([src_list, dst_list], dtype=jnp.int32)
    batch = jnp.repeat(jnp.arange(num_graphs, dtype=jnp.int32),
                       nodes_per_graph)

    params = init_params(kp, nfeat, nhid, nlayer)

    h, emb_list = gin2_forward(x, edge_index, batch, num_graphs, params)
    jax.block_until_ready(h)

    # Correctness vs a pure-f32 reference.  The Pallas path uses bf16
    # activations / weights (f32 accumulation), so tolerances are set for the
    # expected bf16 deviation (typically ~1e-2 absolute for this depth).
    h_ref = gin2_forward_reference(x, edge_index, params)
    h_np = np.asarray(h)
    h_ref_np = np.asarray(h_ref)
    max_err = float(np.max(np.abs(h_np - h_ref_np)))
    rel_err = float(np.linalg.norm(h_np - h_ref_np) / np.linalg.norm(h_ref_np))

    assert h.shape == (N, nhid)
    assert len(emb_list) == num_graphs
    assert all(e.shape == (nodes_per_graph, nhid) for e in emb_list)
    assert np.all(np.isfinite(h_np))
    assert rel_err < 5e-2, f"relative mismatch vs reference: {rel_err}"
    assert max_err < 0.3, f"max abs mismatch vs reference: {max_err}"
    print("KERNEL_OK")
</pallas_src>

<mosaic_0001>
module attributes {stable_mosaic.version = 11 : i64} {
  func.func @kernel(%arg0: i32, %arg1: memref<256x16xf32, #tpu.memory_space<vmem>>, %arg2: memref<16x128xf32, #tpu.memory_space<vmem>>, %arg3: memref<1x128xf32, #tpu.memory_space<vmem>>, %arg4: memref<256x128xbf16, #tpu.memory_space<vmem>>, %arg5: memref<1x1x128xf32, #tpu.memory_space<vmem>>, %arg6: memref<1x1x128xf32, #tpu.memory_space<vmem>>) attributes {dimension_semantics = [#tpu.dimension_semantics<parallel>], iteration_bounds = array<i64: 1>, scalar_prefetch = 0 : i64, scratch_operands = 0 : i64, tpu.core_type = #tpu.core_type<tc>, window_params = [{transform_indices = @transform_0, window_bounds = array<i64: 256, 16>}, {pipeline_mode = #tpu.pipeline_mode<synchronous>, transform_indices = @transform_1, window_bounds = array<i64: 16, 128>}, {pipeline_mode = #tpu.pipeline_mode<synchronous>, transform_indices = @transform_2, window_bounds = array<i64: 1, 128>}, {transform_indices = @transform_3, window_bounds = array<i64: 256, 128>}, {transform_indices = @transform_4, window_bounds = array<i64: 1, 1, 128>}, {transform_indices = @transform_5, window_bounds = array<i64: 1, 1, 128>}]} {
    %c0 = arith.constant 0 : index
    %c0_0 = arith.constant 0 : index
    %0 = vector.load %arg1[%c0, %c0_0] : memref<256x16xf32, #tpu.memory_space<vmem>>, vector<256x16xf32>
    %c0_1 = arith.constant 0 : index
    %c0_2 = arith.constant 0 : index
    %1 = vector.load %arg2[%c0_1, %c0_2] : memref<16x128xf32, #tpu.memory_space<vmem>>, vector<16x128xf32>
    %cst = arith.constant dense<0.000000e+00> : vector<256x128xf32>
    %2 = tpu.matmul %0, %1, %cst {dimension_numbers = #tpu.dot_dimension_numbers<[1], [0], [0], [1], [0, 0, 1, 1], [], []>} : vector<256x16xf32>, vector<16x128xf32>, vector<256x128xf32> -> vector<256x128xf32>
    %c0_3 = arith.constant 0 : index
    %c0_4 = arith.constant 0 : index
    %3 = vector.load %arg3[%c0_3, %c0_4] : memref<1x128xf32, #tpu.memory_space<vmem>>, vector<1x128xf32>
    %4 = vector.broadcast %3 : vector<1x128xf32> to vector<256x128xf32>
    %5 = arith.addf %2, %4 : vector<256x128xf32>
    %c256_i32 = arith.constant 256 : i32
    %6 = arith.muli %arg0, %c256_i32 : i32
    %7 = tpu.iota {dimensions = array<i32: 0>} : vector<256x128xi32>
    %8 = vector.broadcast %6 : i32 to vector<256x128xi32>
    %9 = arith.addi %8, %7 : vector<256x128xi32>
    %c200_i32 = arith.constant 200 : i32
    %10 = vector.broadcast %c200_i32 : i32 to vector<256x128xi32>
    %11 = arith.cmpi slt, %9, %10 : vector<256x128xi32>
    %cst_5 = arith.constant 0.000000e+00 : f32
    %12 = vector.broadcast %cst_5 : f32 to vector<256x128xf32>
    %13 = arith.select %11, %5, %12 : vector<256x128xi1>, vector<256x128xf32>
    %14 = arith.truncf %13 : vector<256x128xf32> to vector<256x128xbf16>
    %c0_6 = arith.constant 0 : index
    %c0_7 = arith.constant 0 : index
    %15 = vector.load %arg4[%c0_6, %c0_7] : memref<256x128xbf16, #tpu.memory_space<vmem>>, vector<256x128xbf16>
    tpu.vector_store %arg4[%c0_6, %c0_7], %14 {strides = array<i32>} : memref<256x128xbf16, #tpu.memory_space<vmem>>, vector<256x128xbf16>,
    %cst_8 = arith.constant dense<0.000000e+00> : vector<128xf32>
    %16 = vector.multi_reduction <add>, %13, %cst_8 [0] : vector<256x128xf32> to vector<128xf32>
    %17 = vector.shape_cast %16 : vector<128xf32> to vector<1x128xf32>
    %18 = vector.shape_cast %17 : vector<1x128xf32> to vector<1x1x128xf32>
    %c0_9 = arith.constant 0 : index
    %c0_10 = arith.constant 0 : index
    %c0_11 = arith.constant 0 : index
    %19 = vector.load %arg5[%c0_9, %c0_10, %c0_11] : memref<1x1x128xf32, #tpu.memory_space<vmem>>, vector<1x1x128xf32>
    tpu.vector_store %arg5[%c0_9, %c0_10, %c0_11], %18 {strides = array<i32>} : memref<1x1x128xf32, #tpu.memory_space<vmem>>, vector<1x1x128xf32>,
    %20 = arith.mulf %13, %13 : vector<256x128xf32>
    %cst_12 = arith.constant dense<0.000000e+00> : vector<128xf32>
    %21 = vector.multi_reduction <add>, %20, %cst_12 [0] : vector<256x128xf32> to vector<128xf32>
    %22 = vector.shape_cast %21 : vector<128xf32> to vector<1x128xf32>
    %23 = vector.shape_cast %22 : vector<1x128xf32> to vector<1x1x128xf32>
    %c0_13 = arith.constant 0 : index
    %c0_14 = arith.constant 0 : index
    %c0_15 = arith.constant 0 : index
    %24 = vector.load %arg6[%c0_13, %c0_14, %c0_15] : memref<1x1x128xf32, #tpu.memory_space<vmem>>, vector<1x1x128xf32>
    tpu.vector_store %arg6[%c0_13, %c0_14, %c0_15], %23 {strides = array<i32>} : memref<1x1x128xf32, #tpu.memory_space<vmem>>, vector<1x1x128xf32>,
    return
  }
  func.func @transform_0(%arg0: i32) -> (i32, i32) {
    %c0_i32 = arith.constant 0 : i32
    %c0_i32_0 = arith.constant 0 : i32
    return %arg0, %c0_i32 : i32, i32
  }
  func.func @transform_1(%arg0: i32) -> (i32, i32) {
    %c0_i32 = arith.constant 0 : i32
    %c0_i32_0 = arith.constant 0 : i32
    %c0_i32_1 = arith.constant 0 : i32
    return %c0_i32, %c0_i32_0 : i32, i32
  }
  func.func @transform_2(%arg0: i32) -> (i32, i32) {
    %c0_i32 = arith.constant 0 : i32
    %c0_i32_0 = arith.constant 0 : i32
    %c0_i32_1 = arith.constant 0 : i32
    return %c0_i32, %c0_i32_0 : i32, i32
  }
  func.func @transform_3(%arg0: i32) -> (i32, i32) {
    %c0_i32 = arith.constant 0 : i32
    %c0_i32_0 = arith.constant 0 : i32
    return %arg0, %c0_i32 : i32, i32
  }
  func.func @transform_4(%arg0: i32) -> (i32, i32, i32) {
    %c0_i32 = arith.constant 0 : i32
    %c0_i32_0 = arith.constant 0 : i32
    %c0_i32_1 = arith.constant 0 : i32
    return %arg0, %c0_i32, %c0_i32_0 : i32, i32, i32
  }
  func.func @transform_5(%arg0: i32) -> (i32, i32, i32) {
    %c0_i32 = arith.constant 0 : i32
    %c0_i32_0 = arith.constant 0 : i32
    %c0_i32_1 = arith.constant 0 : i32
    return %arg0, %c0_i32, %c0_i32_0 : i32, i32, i32
  }
}

</mosaic_0001>

<bundles_post_ra>
// kernel: tpu_custom_call.1
= control target key start
LH: loop header
LB: loop body
LE: loop exit
PB: predicated region body
PF: predicated region fallthrough
CT: control target
= control target key end

     0   :  { %11 = vsyncpa [#allocation3], 0  ;;  %vm57_vm0 = vcmask 130048   ;;  %s1122_s0 = inlined_call_operand.vmem [shape: f32[256,16], index: 0, kind: input, shape index: {}]   ;;  %s1123_s1 = inlined_call_operand.vmem [shape: f32[16,128], index: 1, kind: input, shape index: {}]   ;;  %s1124_s2 = inlined_call_operand.vmem [shape: f32[1,128], index: 2, kind: input, shape index: {}]   ;;  %s1125_s3 = inlined_call_operand.hbm [shape: bf16[256,128], index: 3, kind: output, shape index: {0}]   ;;  %s1126_s4 = inlined_call_operand.hbm [shape: f32[1,1,128], index: 4, kind: output, shape index: {1}]   ;;  %s1127_s5 = inlined_call_operand.hbm [shape: f32[1,1,128], index: 5, kind: output, shape index: {2}]  }
   0x1   :  { %v52_v0 = vld [vmem:[%s1123_s1 + $0x8] sm:$0xff]  ;;  %v51_v1 = vld [vmem:[%s1123_s1] sm:$0xff] }
   0x2   :  { %168 = vmatpush.msra.mxu0 %v52_v0  ;;  %v19_v2 = vld [vmem:[%s1122_s0] sm:$0xff]  ;;  %746 = vmatpush.msra.mxu1 %v52_v0 }
   0x3   :  { %v27_v3 = vld [vmem:[%s1122_s0 + $0x40] sm:$0xff]  ;;  %747 = vmatpush.msra.mxu2 %v52_v0  ;;  %748 = vmatpush.msra.mxu3 %v52_v0 }
   0x4   :  { %169 = vmatpush.msra.mxu0 %v51_v1  ;;  %749 = vmatpush.msra.mxu1 %v51_v1  ;;  %v35_v4 = vld [vmem:[%s1122_s0 + $0x80] sm:$0xff] }
   0x5   :  { %619 = vmatmul.msk.f32.vlgmr.msra.gmra.mxu0 %vm57_vm0, %v19_v2  ;;  %627 = vmatmul.msk.f32.vlgmr.msra.gmra.mxu1 %vm57_vm0, %v27_v3 }
   0x6   :  { %750 = vmatpush.msra.mxu2 %v51_v1  ;;  %751 = vmatpush.msra.mxu3 %v51_v1 }
   0x7   :  { %12 = vsyncpa [#allocation5], 0  ;;  %635 = vmatmul.msk.f32.vlgmr.msra.gmra.mxu2 %vm57_vm0, %v35_v4  ;;  %v20_v5 = vld [vmem:[%s1122_s0 + $0x8] sm:$0xff]  ;;  %v21_v8 = vld [vmem:[%s1122_s0 + $0x10] sm:$0xff]  ;;  %v835_v52 = vmov 0.0|0.0   ;;  %s576_s12 = sshll.u32 %s1125_s3, 4  ;;  %s577_s12 = int_to_ptr.hbm [resolvable:$true] %s576_s12 }
   0x8   :  { %v28_v6 = vld [vmem:[%s1122_s0 + $0x48] sm:$0xff]  ;;  %v29_v9 = vld [vmem:[%s1122_s0 + $0x50] sm:$0xff]  ;;  %v43_v11 = vld [vmem:[%s1122_s0 + $0xc0] sm:$0xff]  ;;  %v713_v53 = vunpack.c.l.bf16 %v835_v52  ;;  %s837_s3 = smov 64   ;;  %s838_s13 = smov 4  }
   0x9   :  { %v36_v7 = vld [vmem:[%s1122_s0 + $0x88] sm:$0xff]  ;;  %v37_v10 = vld [vmem:[%s1122_s0 + $0x90] sm:$0xff]  ;;  %643 = vmatmul.msk.f32.vlgmr.msra.gmra.mxu3 %vm57_vm0, %v43_v11  ;;  %v22_v12 = vld [vmem:[%s1122_s0 + $0x18] sm:$0xff]  ;;  %s839_s14 = smov [#allocation4]   ;;  %s590_s18 = sshll.u32 %s1126_s4, 4  ;;  %s591_s18 = int_to_ptr.hbm [resolvable:$true] %s590_s18 }
   0xa   :  { %v30_v13 = vld [vmem:[%s1122_s0 + $0x58] sm:$0xff]  ;;  %v44_v15 = vld [vmem:[%s1122_s0 + $0xc8] sm:$0xff]  ;;  %v23_v16 = vld [vmem:[%s1122_s0 + $0x20] sm:$0xff]  ;;  %v719_v59 = vpack.c.bf16 %v713_v53, %v713_v53  ;;  %s588_s15 = sshll.u32 %s839_s14, 4  ;;  %s840_s19 = smov [#allocation6]   ;;  %s589_s15 = int_to_ptr.vmem [resolvable:$true] %s588_s15 }
   0xb   :  { %v38_v14 = vld [vmem:[%s1122_s0 + $0x98] sm:$0xff]  ;;  %v31_v17 = vld [vmem:[%s1122_s0 + $0x60] sm:$0xff]  ;;  %v45_v18 = vld [vmem:[%s1122_s0 + $0xd0] sm:$0xff]  ;;  %s599_s20 = sshll.u32 %s840_s19, 4  ;;  %s601_s23 = sshll.u32 %s1127_s5, 4  ;;  %s600_s20 = int_to_ptr.vmem [resolvable:$true] %s599_s20  ;;  %s602_s23 = int_to_ptr.hbm [resolvable:$true] %s601_s23 }
   0xc   :  { %v39_v19 = vld [vmem:[%s1122_s0 + $0xa0] sm:$0xff]  ;;  %v24_v20 = vld [vmem:[%s1122_s0 + $0x28] sm:$0xff]  ;;  %v46_v22 = vld [vmem:[%s1122_s0 + $0xd8] sm:$0xff]  ;;  %743 = vst [vmem:[#allocation2 + $0x68] sm:$0xff] %v719_v59  }
   0xd   :  { %620 = vmatmul.msk.f32.gmra.mxu0 %vm57_vm0, %v20_v5  ;;  %628 = vmatmul.msk.f32.gmra.mxu1 %vm57_vm0, %v28_v6  ;;  %v32_v21 = vld [vmem:[%s1122_s0 + $0x68] sm:$0xff]  ;;  %v25_v24 = vld [vmem:[%s1122_s0 + $0x30] sm:$0xff]  ;;  %v47_v26 = vld [vmem:[%s1122_s0 + $0xe0] sm:$0xff]  ;;  %744 = vst [vmem:[#allocation2 + $0x70] sm:$0xff] %v719_v59  }
   0xe   :  { %v40_v23 = vld [vmem:[%s1122_s0 + $0xa8] sm:$0xff]  ;;  %v33_v25 = vld [vmem:[%s1122_s0 + $0x70] sm:$0xff]  ;;  %v26_v28 = vld [vmem:[%s1122_s0 + $0x38] sm:$0xff]  ;;  %745 = vst [vmem:[#allocation2 + $0x78] sm:$0xff] %v719_v59  }
   0xf   :  { %636 = vmatmul.msk.f32.gmra.mxu2 %vm57_vm0, %v36_v7  ;;  %v41_v27 = vld [vmem:[%s1122_s0 + $0xb0] sm:$0xff]  ;;  %v34_v29 = vld [vmem:[%s1122_s0 + $0x78] sm:$0xff]  ;;  %v48_v30 = vld [vmem:[%s1122_s0 + $0xe8] sm:$0xff] }
  0x10   :  { %v42_v31 = vld [vmem:[%s1122_s0 + $0xb8] sm:$0xff]  ;;  %v49_v32 = vld [vmem:[%s1122_s0 + $0xf0] sm:$0xff]  ;;  %v1008_v36 = vld [vmem:[%s1124_s2] ss:$0 sm:$0xff] }
  0x11   :  { %644 = vmatmul.msk.f32.gmra.mxu3 %vm57_vm0, %v44_v15  ;;  %v50_v33 = vld [vmem:[%s1122_s0 + $0xf8] sm:$0xff]  ;;  %s836_s0 = smov [#allocation2]  }
  0x12   :  { %s574_s2 = sshll.u32 %s836_s0, 4  ;;  %s575_s2 = int_to_ptr.vmem [resolvable:$true] %s574_s2 }
  0x15   :  { %621 = vmatmul.msk.f32.gmra.mxu0 %vm57_vm0, %v21_v8  ;;  %629 = vmatmul.msk.f32.gmra.mxu1 %vm57_vm0, %v29_v9 }
  0x17   :  { %637 = vmatmul.msk.f32.gmra.mxu2 %vm57_vm0, %v37_v10 }
  0x19   :  { %645 = vmatmul.msk.f32.gmra.mxu3 %vm57_vm0, %v45_v18 }
  0x1d   :  { %622 = vmatmul.msk.f32.gmra.mxu0 %vm57_vm0, %v22_v12  ;;  %630 = vmatmul.msk.f32.gmra.mxu1 %vm57_vm0, %v30_v13 }
  0x1f   :  { %638 = vmatmul.msk.f32.gmra.mxu2 %vm57_vm0, %v38_v14 }
  0x21   :  { %646 = vmatmul.msk.f32.gmra.mxu3 %vm57_vm0, %v46_v22 }
  0x25   :  { %623 = vmatmul.msk.f32.gmra.mxu0 %vm57_vm0, %v23_v16  ;;  %631 = vmatmul.msk.f32.gmra.mxu1 %vm57_vm0, %v31_v17 }
  0x27   :  { %639 = vmatmul.msk.f32.gmra.mxu2 %vm57_vm0, %v39_v19 }
  0x29   :  { %647 = vmatmul.msk.f32.gmra.mxu3 %vm57_vm0, %v47_v26 }
  0x2d   :  { %624 = vmatmul.msk.f32.gmra.mxu0 %vm57_vm0, %v24_v20  ;;  %632 = vmatmul.msk.f32.gmra.mxu1 %vm57_vm0, %v32_v21 }
  0x2f   :  { %640 = vmatmul.msk.f32.gmra.mxu2 %vm57_vm0, %v40_v23 }
  0x31   :  { %648 = vmatmul.msk.f32.gmra.mxu3 %vm57_vm0, %v48_v30 }
  0x35   :  { %625 = vmatmul.msk.f32.gmra.mxu0 %vm57_vm0, %v25_v24  ;;  %633 = vmatmul.msk.f32.gmra.mxu1 %vm57_vm0, %v33_v25 }
  0x37   :  { %641 = vmatmul.msk.f32.gmra.mxu2 %vm57_vm0, %v41_v27 }
  0x39   :  { %649 = vmatmul.msk.f32.gmra.mxu3 %vm57_vm0, %v49_v32 }
  0x3d   :  { %626 = vmatmul.msk.f32.gmra.mxu0 %vm57_vm0, %v26_v28  ;;  %634 = vmatmul.msk.f32.gmra.mxu1 %vm57_vm0, %v34_v29 }
  0x3f   :  { %642 = vmatmul.msk.f32.gmra.mxu2 %vm57_vm0, %v42_v31 }
  0x41   :  { %650 = vmatmul.msk.f32.gmra.mxu3 %vm57_vm0, %v50_v33 }
  0x82   :  { %v171_v34 = vpop.f32.mrf.mxu0  ;;  %v195_v35 = vpop.f32.mrf.mxu1 }
  0x83   :  { %v1011_v37 = vadd.f32 %v1008_v36, %v195_v35  ;;  %v172_v40 = vadd.f32 %v1008_v36, %v171_v34 }
  0x85   :  { %v500_v21 = vmul.f32 %v172_v40, %v172_v40 }
  0x8a   :  { %v174_v38 = vpop.f32.mrf.mxu0  ;;  %v198_v39 = vpop.f32.mrf.mxu1 }
  0x8b   :  { %v175_v41 = vadd.f32 %v1008_v36, %v174_v38  ;;  %v1016_v42 = vadd.f32 %v1008_v36, %v198_v39  ;;  %v219_v43 = vpop.f32.mrf.mxu2 }
  0x8c   :  { %v1021_v48 = vadd.f32 %v1008_v36, %v219_v43  ;;  %v243_v55 = vpop.f32.mrf.mxu3 }
  0x8d   :  { %v654_v44 = vpack.c.bf16 %v175_v41, %v172_v40  ;;  %v674_v45 = vpack.c.bf16 %v1016_v42, %v1011_v37  ;;  %v1032_v58 = vadd.f32 %v1008_v36, %v243_v55  ;;  %v501_v20 = vmul.f32 %v175_v41, %v175_v41 }
  0x8e   :  { %v462_v23 = vadd.f32 %v175_v41, %v172_v40 }
  0x8f   :  { %655 = vst [vmem:[#allocation2] sm:$0xff] %v654_v44   ;;  %v714_v0 = vpack.c.bf16 %v713_v53, %v1032_v58  ;;  %v532_v25 = vadd.f32 %v501_v20, %v500_v21 }
  0x90   :  { %734 = vst [vmem:[#allocation2 + $0x20] sm:$0xff] %v674_v45  }
  0x91   :  { %742 = vst [vmem:[#allocation2 + $0x60] sm:$0xff] %v714_v0  }
  0x92   :  { %v177_v46 = vpop.f32.mrf.mxu0  ;;  %v201_v47 = vpop.f32.mrf.mxu1 }
  0x93   :  { %v222_v49 = vpop.f32.mrf.mxu2  ;;  %v1029_v54 = vadd.f32 %v1008_v36, %v201_v47  ;;  %v178_v60 = vadd.f32 %v1008_v36, %v177_v46 }
  0x94   :  { %v1024_v50 = vadd.f32 %v1008_v36, %v222_v49  ;;  %v246_v3 = vpop.f32.mrf.mxu3 }
  0x95   :  { %v502_v22 = vmul.f32 %v178_v60, %v178_v60  ;;  %v463_v30 = vadd.f32 %v462_v23, %v178_v60 }
  0x96   :  { %v694_v51 = vpack.c.bf16 %v1024_v50, %v1021_v48 }
  0x97   :  { %v533_v32 = vadd.f32 %v532_v25, %v502_v22 }
  0x98   :  { %738 = vst [vmem:[#allocation2 + $0x40] sm:$0xff] %v694_v51  }
  0x9a   :  { %v180_v56 = vpop.f32.mrf.mxu0  ;;  %v204_v57 = vpop.f32.mrf.mxu1 }
  0x9b   :  { %v181_v61 = vadd.f32 %v1008_v36, %v180_v56  ;;  %v1037_v62 = vadd.f32 %v1008_v36, %v204_v57  ;;  %v225_v63 = vpop.f32.mrf.mxu2 }
  0x9c   :  { %v1043_v6 = vadd.f32 %v1008_v36, %v225_v63  ;;  %v249_v11 = vpop.f32.mrf.mxu3 }
  0x9d   :  { %v659_v1 = vpack.c.bf16 %v181_v61, %v178_v60  ;;  %v679_v2 = vpack.c.bf16 %v1037_v62, %v1029_v54  ;;  %v503_v26 = vmul.f32 %v181_v61, %v181_v61  ;;  %v464_v38 = vadd.f32 %v463_v30, %v181_v61 }
  0x9f   :  { %731 = vst [vmem:[#allocation2 + $0x8] sm:$0xff] %v659_v1   ;;  %v534_v39 = vadd.f32 %v533_v32, %v503_v26 }
  0xa0   :  { %735 = vst [vmem:[#allocation2 + $0x28] sm:$0xff] %v679_v2   ;;  %v508_v2 = vmul.f32 %v1011_v37, %v1011_v37 }
  0xa2   :  { %v183_v4 = vpop.f32.mrf.mxu0  ;;  %v207_v5 = vpop.f32.mrf.mxu1 }
  0xa3   :  { %v228_v7 = vpop.f32.mrf.mxu2  ;;  %v1051_v10 = vadd.f32 %v1008_v36, %v207_v5  ;;  %v184_v14 = vadd.f32 %v1008_v36, %v183_v4  ;;  %v509_v5 = vmul.f32 %v1016_v42, %v1016_v42 }
  0xa4   :  { %v1046_v8 = vadd.f32 %v1008_v36, %v228_v7  ;;  %v252_v24 = vpop.f32.mrf.mxu3 }
  0xa5   :  { %v504_v33 = vmul.f32 %v184_v14, %v184_v14  ;;  %v465_v43 = vadd.f32 %v464_v38, %v184_v14  ;;  %v512_v21 = vmul.f32 %v1051_v10, %v1051_v10 }
  0xa6   :  { %v699_v9 = vpack.c.bf16 %v1046_v8, %v1043_v6 }
  0xa7   :  { %v535_v44 = vadd.f32 %v534_v39, %v504_v33 }
  0xa8   :  { %739 = vst [vmem:[#allocation2 + $0x48] sm:$0xff] %v699_v9  }
  0xaa   :  { %v186_v12 = vpop.f32.mrf.mxu0  ;;  %v210_v13 = vpop.f32.mrf.mxu1 }
  0xab   :  { %v187_v15 = vadd.f32 %v1008_v36, %v186_v12  ;;  %v1056_v16 = vadd.f32 %v1008_v36, %v210_v13  ;;  %v231_v17 = vpop.f32.mrf.mxu2 }
  0xac   :  { %v1061_v29 = vadd.f32 %v1008_v36, %v231_v17  ;;  %v255_v49 = vpop.f32.mrf.mxu3 }
  0xad   :  { %v664_v18 = vpack.c.bf16 %v187_v15, %v184_v14  ;;  %v684_v19 = vpack.c.bf16 %v1056_v16, %v1051_v10  ;;  %v505_v40 = vmul.f32 %v187_v15, %v187_v15  ;;  %v466_v46 = vadd.f32 %v465_v43, %v187_v15 }
  0xaf   :  { %732 = vst [vmem:[#allocation2 + $0x10] sm:$0xff] %v664_v18   ;;  %v536_v51 = vadd.f32 %v535_v44, %v505_v40  ;;  %v518_v40 = vmul.f32 %v1043_v6, %v1043_v6  ;;  %v519_v44 = vmul.f32 %v1046_v8, %v1046_v8 }
  0xb0   :  { %736 = vst [vmem:[#allocation2 + $0x30] sm:$0xff] %v684_v19  }
  0xb2   :  { %v189_v27 = vpop.f32.mrf.mxu0  ;;  %v213_v28 = vpop.f32.mrf.mxu1 }
  0xb3   :  { %v234_v31 = vpop.f32.mrf.mxu2  ;;  %v190_v34 = vadd.f32 %v1008_v36, %v189_v27  ;;  %v214_v47 = vadd.f32 %v1008_v36, %v213_v28 }
  0xb4   :  { %v1065_v35 = vadd.f32 %v1008_v36, %v234_v31  ;;  %v258_v11 = vpop.f32.mrf.mxu3 }
  0xb5   :  { %v506_v45 = vmul.f32 %v190_v34, %v190_v34  ;;  %v467_v55 = vadd.f32 %v466_v46, %v190_v34  ;;  %v514_v26 = vmul.f32 %v214_v47, %v214_v47  ;;  %v520_v46 = vmul.f32 %v1061_v29, %v1061_v29 }
  0xb6   :  { %v704_v41 = vpack.c.bf16 %v1065_v35, %v1061_v29 }
  0xb7   :  { %v537_v60 = vadd.f32 %v536_v51, %v506_v45  ;;  %v521_v51 = vmul.f32 %v1065_v35, %v1065_v35 }
  0xb8   :  { %740 = vst [vmem:[#allocation2 + $0x50] sm:$0xff] %v704_v41  }
  0xba   :  { %v192_v52 = vpop.f32.mrf.mxu0  ;;  %v216_v53 = vpop.f32.mrf.mxu1 }
  0xbb   :  { %v193_v56 = vadd.f32 %v1008_v36, %v192_v52  ;;  %v217_v57 = vadd.f32 %v1008_v36, %v216_v53  ;;  %v237_v59 = vpop.f32.mrf.mxu2 }
  0xbc   :  { %v238_v12 = vadd.f32 %v1008_v36, %v237_v59  ;;  %v261_v25 = vpop.f32.mrf.mxu3 }
  0xbd   :  { %v669_v61 = vpack.c.bf16 %v193_v56, %v190_v34  ;;  %v468_v63 = vadd.f32 %v467_v55, %v193_v56  ;;  %v507_v0 = vmul.f32 %v193_v56, %v193_v56  ;;  %v689_v1 = vpack.c.bf16 %v217_v57, %v214_v47 }
  0xbe   :  { %v515_v28 = vmul.f32 %v217_v57, %v217_v57  ;;  %v522_v55 = vmul.f32 %v238_v12, %v238_v12 }
  0xbf   :  { %733 = vst [vmem:[#allocation2 + $0x18] sm:$0xff] %v669_v61   ;;  %v469_v3 = vadd.f32 %v468_v63, %v1011_v37  ;;  %v538_v4 = vadd.f32 %v537_v60, %v507_v0  ;;  %v510_v37 = vmul.f32 %v1029_v54, %v1029_v54 }
  0xc0   :  { %737 = vst [vmem:[#allocation2 + $0x38] sm:$0xff] %v689_v1  }
  0xc1   :  { %v470_v7 = vadd.f32 %v469_v3, %v1016_v42  ;;  %v539_v9 = vadd.f32 %v538_v4, %v508_v2  ;;  %v511_v42 = vmul.f32 %v1037_v62, %v1037_v62 }
  0xc3   :  { %v471_v13 = vadd.f32 %v470_v7, %v1029_v54  ;;  %v540_v14 = vadd.f32 %v539_v9, %v509_v5  ;;  %v240_v15 = vpop.f32.mrf.mxu2  ;;  %v513_v54 = vmul.f32 %v1056_v16, %v1056_v16 }
  0xc4   :  { %v241_v17 = vadd.f32 %v1008_v36, %v240_v15  ;;  %v264_v39 = vpop.f32.mrf.mxu3 }
  0xc5   :  { %v541_v18 = vadd.f32 %v540_v14, %v510_v37  ;;  %v472_v19 = vadd.f32 %v471_v13, %v1037_v62 }
  0xc6   :  { %v709_v20 = vpack.c.bf16 %v241_v17, %v238_v12  ;;  %v523_v56 = vmul.f32 %v241_v17, %v241_v17 }
  0xc7   :  { %v473_v22 = vadd.f32 %v472_v19, %v1051_v10  ;;  %v542_v23 = vadd.f32 %v541_v18, %v511_v42  ;;  %v516_v10 = vmul.f32 %v1021_v48, %v1021_v48 }
  0xc8   :  { %741 = vst [vmem:[#allocation2 + $0x58] sm:$0xff] %v709_v20  }
  0xc9   :  { %v474_v36 = vadd.f32 %v473_v22, %v1056_v16  ;;  %v543_v24 = vadd.f32 %v542_v23, %v512_v21  ;;  %582 = dma.vmem_to_hbm [thread:$0]  %s575_s2, 2048, %s577_s12, [#allocation3], %s837_s3, %s837_s3, %s838_s13   ;;  %v517_v16 = vmul.f32 %v1024_v50, %v1024_v50 }
  0xcb   :  { %v475_v62 = vadd.f32 %v474_v36, %v214_v47  ;;  %v544_v27 = vadd.f32 %v543_v24, %v513_v54 }
  0xcd   :  { %v545_v30 = vadd.f32 %v544_v27, %v514_v26  ;;  %v476_v31 = vadd.f32 %v475_v62, %v217_v57 }
  0xcf   :  { %v477_v32 = vadd.f32 %v476_v31, %v1021_v48  ;;  %v546_v33 = vadd.f32 %v545_v30, %v515_v28 }
  0xd1   :  { %v478_v34 = vadd.f32 %v477_v32, %v1024_v50  ;;  %v547_v38 = vadd.f32 %v546_v33, %v516_v10 }
  0xd3   :  { %v548_v41 = vadd.f32 %v547_v38, %v517_v16  ;;  %v479_v43 = vadd.f32 %v478_v34, %v1043_v6 }
  0xd5   :  { %v480_v45 = vadd.f32 %v479_v43, %v1046_v8  ;;  %v549_v48 = vadd.f32 %v548_v41, %v518_v40  ;;  %v524_v8 = vmul.f32 %v1032_v58, %v1032_v58 }
  0xd7   :  { %v481_v47 = vadd.f32 %v480_v45, %v1061_v29  ;;  %v550_v50 = vadd.f32 %v549_v48, %v519_v44 }
  0xd9   :  { %v482_v49 = vadd.f32 %v481_v47, %v1065_v35  ;;  %v551_v52 = vadd.f32 %v550_v50, %v520_v46 }
  0xdb   :  { %v552_v53 = vadd.f32 %v551_v52, %v521_v51  ;;  %v483_v6 = vadd.f32 %v482_v49, %v238_v12 }
  0xdd   :  { %v553_v57 = vadd.f32 %v552_v53, %v522_v55  ;;  %v484_v59 = vadd.f32 %v483_v6, %v241_v17 }
  0xdf   :  { %v485_v60 = vadd.f32 %v484_v59, %v1032_v58  ;;  %v554_v61 = vadd.f32 %v553_v57, %v523_v56 }
  0xe1   :  { %v493_v29 = vrot.slane %v485_v60, 4  ;;  %v555_v63 = vadd.f32 %v554_v61, %v524_v8 }
  0xe3   :  { %v494_v0 = vadd.f32 %v493_v29, %v485_v60  ;;  %v563_v1 = vrot.slane %v555_v63, 4 }
  0xe5   :  { %v495_v2 = vrot.slane %v494_v0, 2  ;;  %v564_v3 = vadd.f32 %v563_v1, %v555_v63 }
  0xe7   :  { %v496_v35 = vadd.f32 %v495_v2, %v494_v0  ;;  %v565_v4 = vrot.slane %v564_v3, 2 }
  0xe9   :  { %v497_v5 = vrot.slane %v496_v35, 1  ;;  %v566_v7 = vadd.f32 %v565_v4, %v564_v3 }
  0xeb   :  { %v498_v58 = vadd.f32 %v497_v5, %v496_v35  ;;  %v567_v9 = vrot.slane %v566_v7, 1 }
  0xed   :  { %499 = vst [vmem:[#allocation4] sm:$0x1] %v498_v58  ;;  %v568_v11 = vadd.f32 %v567_v9, %v566_v7 }
  0xee   :  { %593 = dma.vmem_to_hbm [thread:$0]  %s589_s15, 16, %s591_s18, [#allocation5]  }
  0xef   :  { %569 = vst [vmem:[#allocation6] sm:$0x1] %v568_v11 }
  0xf0   :  { %604 = dma.vmem_to_hbm [thread:$0]  %s600_s20, 16, %s602_s23, [#allocation5]  }
  0xf1   :  { %831 = dma.done.wait [#allocation3], 2048  }
  0xf2   :  { %832 = vsyncadd [#allocation3], 4294965248 }
  0xf3   :  { %833 = dma.done.wait [#allocation5], 32  }
  0xf4   :  { %834 = vsyncadd [#allocation5], 4294967264 }
  0xf5   :  { %617 = vsyncpa [#allocation3], 1 }
  0xf6   :  { %618 = vsyncpa [#allocation5], 1 }

</bundles_post_ra>
